<compile_context>
chip_gen: v5e
topology: v5e:2x2
jax: 0.10.0
libtpu: 0.0.40
codegen_flags: <defaults>
</compile_context>

<pallas_src>
import jax
import jax.numpy as jnp
from jax.experimental import pallas as pl
from jax.experimental.pallas import tpu as pltpu


def _round_up(n: int, m: int) -> int:
    return ((n + m - 1) // m) * m


# ----------------------------- Pallas kernel --------------------------------

def _mlp_head_kernel(emb_ref, iedb_ref, w1e_ref, w1i_ref, b1_ref,
                     w2_ref, b2_ref, w3_ref, b3_ref, o_ref):
    """Fused 3-layer MLP head (concat + Linear/SiLU x2 + Linear) on one token tile."""
    # ---- Layer 1: Linear(D+2 -> H) with the concat fused as two matmuls ----
    # emb and W1_emb are bf16 -> native MXU bf16 path, f32 accumulation.
    h1 = jnp.dot(emb_ref[...], w1e_ref[...],
                 preferred_element_type=jnp.float32)               # (TM, H)
    h1 = h1 + jnp.dot(iedb_ref[...], w1i_ref[...],
                      preferred_element_type=jnp.float32)          # (TM,2)@(2,H)
    h1 = h1 + b1_ref[...]                                          # (1, H) bcast
    # SiLU in f32; exp and approx reciprocal both go to the EUP slot.
    h1 = h1 * pl.reciprocal(1.0 + jnp.exp(-h1), approx=True)

    # (Dropout is identity in eval/inference mode.)

    # ---- Layer 2: Linear(H -> H//2) + SiLU ----
    h2 = jnp.dot(h1.astype(jnp.bfloat16), w2_ref[...],
                 preferred_element_type=jnp.float32)               # (TM, H2)
    h2 = h2 + b2_ref[...]
    h2 = h2 * pl.reciprocal(1.0 + jnp.exp(-h2), approx=True)

    # ---- Layer 3: Linear(H//2 -> 1), computed as W3_row @ h2^T so the logit
    # tile lands lane-dense (tokens on the lane axis -> unmasked stores). ----
    o = jax.lax.dot_general(
        w3_ref[...], h2,                                           # (1,H2),(TM,H2)
        dimension_numbers=(((1,), (1,)), ((), ())),
        preferred_element_type=jnp.float32)                        # (1, TM)
    o = o + b3_ref[...]                                            # (1, 1) bcast
    o_ref[...] = o.reshape(o_ref.shape).astype(o_ref.dtype)


# ------------------------------ wrapper / glue -------------------------------

def mlp_head_pallas(emb, iedb, w1e, w1i, b1, w2, b2, w3_row, b3, *, tile_m=512):
    """emb: (M, D) bf16, iedb: (M, 2) f32.  Returns (M,) f32 logits."""
    M, D = emb.shape
    H = w1e.shape[1]
    H2 = w2.shape[1]

    # Large token tiles amortize the ~0.35us/step grid overhead; keep tile_m a
    # multiple of 128 and shrink it for tiny inputs.  Pad M instead of asserting.
    # v7x: 64 MiB VMEM/TC -> cap tile_m ~1024 at real ESM dims (~2048 in bf16).
    # v6e/v5e: 128 MiB VMEM -> 2048-4096 bf16 rows are comfortable.
    tile_m = min(tile_m, _round_up(M, 128))
    M_pad = _round_up(M, tile_m)
    if M_pad != M:
        emb = jnp.pad(emb, ((0, M_pad - M), (0, 0)))
        iedb = jnp.pad(iedb, ((0, M_pad - M), (0, 0)))
    num_tiles = M_pad // tile_m

    def resident(shape):
        # Weights/biases never change across grid steps: single-buffer them so
        # they stay resident in VMEM (default double-buffer wastes VMEM that is
        # better spent on a larger token tile).
        return pl.BlockSpec(shape, lambda *_: (0,) * len(shape),
                            pipeline_mode=pl.Buffered(1))

    out = pl.pallas_call(
        _mlp_head_kernel,
        out_shape=jax.ShapeDtypeStruct((num_tiles, 1, tile_m), jnp.float32),
        grid_spec=pltpu.PrefetchScalarGridSpec(
            num_scalar_prefetch=0,
            grid=(num_tiles,),
            in_specs=[
                pl.BlockSpec((tile_m, D), lambda i: (i, 0)),   # emb tile (bf16)
                pl.BlockSpec((tile_m, 2), lambda i: (i, 0)),   # iedb tile (f32)
                resident((D, H)),        # W1_emb  (bf16)
                resident((2, H)),        # W1_iedb (f32)
                resident((1, H)),        # b1
                resident((H, H2)),       # W2      (bf16)
                resident((1, H2)),       # b2
                resident((1, H2)),       # W3 row  (f32)
                resident((1, 1)),        # b3
            ],
            out_specs=pl.BlockSpec((1, 1, tile_m), lambda i: (i, 0, 0)),
        ),
        compiler_params=pltpu.CompilerParams(
            dimension_semantics=("parallel",),     # token tiles shard across v7x's 2 TCs
            vmem_limit_bytes=48 * 1024 * 1024,     # explicit budget, < v7x 64 MiB VMEM
        ),
    )(emb, iedb, w1e, w1i, b1, w2, b2, w3_row, b3)

    return out.reshape(M_pad)[:M]


def init_params(key, vocab_size, esm_dim, mlp_hidden_dim):
    """Deterministic synthetic parameters (stand-in for the checkpoint)."""
    k = jax.random.split(key, 7)
    d, h, h2 = esm_dim, mlp_hidden_dim, mlp_hidden_dim // 2
    s1 = 1.0 / jnp.sqrt(jnp.float32(d + 2))
    s2 = 1.0 / jnp.sqrt(jnp.float32(h))
    s3 = 1.0 / jnp.sqrt(jnp.float32(h2))
    u = lambda kk, shape: jax.random.uniform(kk, shape, jnp.float32, -1.0, 1.0)
    w1 = u(k[1], (d + 2, h)) * s1              # nn.Linear weight stored as (in, out)
    return {
        # stand-in for the frozen ESM representation layer, kept in bf16 so the
        # dominant activation stream into the kernel is half-width
        "esm_embed": (jax.random.normal(k[0], (vocab_size, d), jnp.float32)
                      * 0.02).astype(jnp.bfloat16),
        "w1_emb": w1[:d, :].astype(jnp.bfloat16),   # concat fusion: split W1
        "w1_iedb": w1[d:, :],                        # (2, H) f32
        "b1": u(k[2], (1, h)) * s1,
        "w2": (u(k[3], (h, h2)) * s2).astype(jnp.bfloat16),
        "b2": u(k[4], (1, h2)) * s2,
        "w3_row": u(k[5], (1, h2)) * s3,             # layer-3 weight, stored as a row
        "b3": u(k[6], (1, 1)) * s3,
    }


def epitope_prediction_forward(params, X, iedb_emb):
    """X: (B, L) int32 token ids; iedb_emb: (B, L, 2) f32 -> (B, L, 1) f32."""
    B, L = X.shape
    # Frozen "ESM" representation: synthetic embedding lookup (plain JAX glue).
    emb = jnp.take(params["esm_embed"], X, axis=0)         # (B, L, D) bf16
    emb2 = emb.reshape(B * L, -1)
    iedb2 = iedb_emb.reshape(B * L, 2).astype(jnp.float32)
    out = mlp_head_pallas(emb2, iedb2,
                          params["w1_emb"], params["w1_iedb"], params["b1"],
                          params["w2"], params["b2"],
                          params["w3_row"], params["b3"])
    return out.reshape(B, L, 1)


# ----------------------------------- main ------------------------------------

if __name__ == "__main__":
    # Small shapes consistent with the module's forward:
    B, L = 2, 8              # batch, sequence length
    VOCAB = 33               # ESM alphabet size
    ESM_DIM = 32             # esm_dim
    MLP_HIDDEN = 32          # mlp_hidden_dim

    key = jax.random.PRNGKey(0)
    k_tok, k_iedb, k_param = jax.random.split(key, 3)

    X = jax.random.randint(k_tok, (B, L), 0, VOCAB, dtype=jnp.int32)
    iedb_emb = jax.random.normal(k_iedb, (B, L, 2), jnp.float32)
    params = init_params(k_param, VOCAB, ESM_DIM, MLP_HIDDEN)

    out = epitope_prediction_forward(params, X, iedb_emb)
    out = jax.block_until_ready(out)

    assert out.shape == (B, L, 1), out.shape
    assert out.dtype == jnp.float32

    # Pure-JAX reference of the MLP head (mirrors the kernel's dtype flow,
    # exact sigmoid instead of the approx EUP reciprocal).
    sig = lambda t: 1.0 / (1.0 + jnp.exp(-t))
    emb_r = jnp.take(params["esm_embed"], X, axis=0).reshape(B * L, -1)   # bf16
    iedb_r = iedb_emb.reshape(B * L, 2).astype(jnp.float32)
    h1 = jnp.dot(emb_r, params["w1_emb"], preferred_element_type=jnp.float32)
    h1 = h1 + jnp.dot(iedb_r, params["w1_iedb"],
                      preferred_element_type=jnp.float32)
    h1 = h1 + params["b1"]
    h1 = h1 * sig(h1)
    h2 = jnp.dot(h1.astype(jnp.bfloat16), params["w2"],
                 preferred_element_type=jnp.float32)
    h2 = h2 + params["b2"]
    h2 = h2 * sig(h2)
    ref = jnp.dot(h2, params["w3_row"].T,
                  preferred_element_type=jnp.float32) + params["b3"]
    ref = ref.reshape(B, L, 1)

    assert jnp.allclose(out, ref, atol=5e-3, rtol=5e-3), (
        float(jnp.max(jnp.abs(out - ref))))

    print("KERNEL_OK")
</pallas_src>

<mosaic_0001>
module attributes {stable_mosaic.version = 11 : i64} {
  func.func @_mlp_head_kernel(%arg0: i32, %arg1: memref<128x32xbf16, #tpu.memory_space<vmem>>, %arg2: memref<128x2xf32, #tpu.memory_space<vmem>>, %arg3: memref<32x32xbf16, #tpu.memory_space<vmem>>, %arg4: memref<2x32xf32, #tpu.memory_space<vmem>>, %arg5: memref<1x32xf32, #tpu.memory_space<vmem>>, %arg6: memref<32x16xbf16, #tpu.memory_space<vmem>>, %arg7: memref<1x16xf32, #tpu.memory_space<vmem>>, %arg8: memref<1x16xf32, #tpu.memory_space<vmem>>, %arg9: memref<1x1xf32, #tpu.memory_space<vmem>>, %arg10: memref<1x1x128xf32, #tpu.memory_space<vmem>>) attributes {dimension_semantics = [#tpu.dimension_semantics<parallel>], iteration_bounds = array<i64: 1>, scalar_prefetch = 0 : i64, scratch_operands = 0 : i64, tpu.core_type = #tpu.core_type<tc>, window_params = [{transform_indices = @transform_0, window_bounds = array<i64: 128, 32>}, {transform_indices = @transform_1, window_bounds = array<i64: 128, 2>}, {pipeline_mode = #tpu.pipeline_mode<synchronous>, transform_indices = @transform_2, window_bounds = array<i64: 32, 32>}, {pipeline_mode = #tpu.pipeline_mode<synchronous>, transform_indices = @transform_3, window_bounds = array<i64: 2, 32>}, {pipeline_mode = #tpu.pipeline_mode<synchronous>, transform_indices = @transform_4, window_bounds = array<i64: 1, 32>}, {pipeline_mode = #tpu.pipeline_mode<synchronous>, transform_indices = @transform_5, window_bounds = array<i64: 32, 16>}, {pipeline_mode = #tpu.pipeline_mode<synchronous>, transform_indices = @transform_6, window_bounds = array<i64: 1, 16>}, {pipeline_mode = #tpu.pipeline_mode<synchronous>, transform_indices = @transform_7, window_bounds = array<i64: 1, 16>}, {pipeline_mode = #tpu.pipeline_mode<synchronous>, transform_indices = @transform_8, window_bounds = array<i64: 1, 1>}, {transform_indices = @transform_9, window_bounds = array<i64: 1, 1, 128>}]} {
    %c0 = arith.constant 0 : index
    %c0_0 = arith.constant 0 : index
    %0 = vector.load %arg1[%c0, %c0_0] : memref<128x32xbf16, #tpu.memory_space<vmem>>, vector<128x32xbf16>
    %c0_1 = arith.constant 0 : index
    %c0_2 = arith.constant 0 : index
    %1 = vector.load %arg3[%c0_1, %c0_2] : memref<32x32xbf16, #tpu.memory_space<vmem>>, vector<32x32xbf16>
    %cst = arith.constant dense<0.000000e+00> : vector<128x32xf32>
    %2 = tpu.matmul %0, %1, %cst {dimension_numbers = #tpu.dot_dimension_numbers<[1], [0], [0], [1], [0, 0, 1, 1], [], []>} : vector<128x32xbf16>, vector<32x32xbf16>, vector<128x32xf32> -> vector<128x32xf32>
    %c0_3 = arith.constant 0 : index
    %c0_4 = arith.constant 0 : index
    %3 = vector.load %arg2[%c0_3, %c0_4] : memref<128x2xf32, #tpu.memory_space<vmem>>, vector<128x2xf32>
    %c0_5 = arith.constant 0 : index
    %c0_6 = arith.constant 0 : index
    %4 = vector.load %arg4[%c0_5, %c0_6] : memref<2x32xf32, #tpu.memory_space<vmem>>, vector<2x32xf32>
    %cst_7 = arith.constant dense<0.000000e+00> : vector<128x32xf32>
    %5 = tpu.matmul %3, %4, %cst_7 {dimension_numbers = #tpu.dot_dimension_numbers<[1], [0], [0], [1], [0, 0, 1, 1], [], []>} : vector<128x2xf32>, vector<2x32xf32>, vector<128x32xf32> -> vector<128x32xf32>
    %6 = arith.addf %2, %5 : vector<128x32xf32>
    %c0_8 = arith.constant 0 : index
    %c0_9 = arith.constant 0 : index
    %7 = vector.load %arg5[%c0_8, %c0_9] : memref<1x32xf32, #tpu.memory_space<vmem>>, vector<1x32xf32>
    %8 = vector.broadcast %7 : vector<1x32xf32> to vector<128x32xf32>
    %9 = arith.addf %6, %8 : vector<128x32xf32>
    %cst_10 = arith.constant 0.000000e+00 : f32
    %10 = vector.broadcast %cst_10 : f32 to vector<128x32xf32>
    %11 = arith.subf %10, %9 : vector<128x32xf32>
    %12 = math.exp %11 : vector<128x32xf32>
    %cst_11 = arith.constant 1.000000e+00 : f32
    %13 = vector.broadcast %cst_11 : f32 to vector<128x32xf32>
    %14 = arith.addf %13, %12 : vector<128x32xf32>
    %15 = tpu.reciprocal %14 {approx = true} : vector<128x32xf32> -> vector<128x32xf32>
    %16 = arith.mulf %9, %15 : vector<128x32xf32>
    %17 = arith.truncf %16 : vector<128x32xf32> to vector<128x32xbf16>
    %c0_12 = arith.constant 0 : index
    %c0_13 = arith.constant 0 : index
    %18 = vector.load %arg6[%c0_12, %c0_13] : memref<32x16xbf16, #tpu.memory_space<vmem>>, vector<32x16xbf16>
    %cst_14 = arith.constant dense<0.000000e+00> : vector<128x16xf32>
    %19 = tpu.matmul %17, %18, %cst_14 {dimension_numbers = #tpu.dot_dimension_numbers<[1], [0], [0], [1], [0, 0, 1, 1], [], []>} : vector<128x32xbf16>, vector<32x16xbf16>, vector<128x16xf32> -> vector<128x16xf32>
    %c0_15 = arith.constant 0 : index
    %c0_16 = arith.constant 0 : index
    %20 = vector.load %arg7[%c0_15, %c0_16] : memref<1x16xf32, #tpu.memory_space<vmem>>, vector<1x16xf32>
    %21 = vector.broadcast %20 : vector<1x16xf32> to vector<128x16xf32>
    %22 = arith.addf %19, %21 : vector<128x16xf32>
    %cst_17 = arith.constant 0.000000e+00 : f32
    %23 = vector.broadcast %cst_17 : f32 to vector<128x16xf32>
    %24 = arith.subf %23, %22 : vector<128x16xf32>
    %25 = math.exp %24 : vector<128x16xf32>
    %cst_18 = arith.constant 1.000000e+00 : f32
    %26 = vector.broadcast %cst_18 : f32 to vector<128x16xf32>
    %27 = arith.addf %26, %25 : vector<128x16xf32>
    %28 = tpu.reciprocal %27 {approx = true} : vector<128x16xf32> -> vector<128x16xf32>
    %29 = arith.mulf %22, %28 : vector<128x16xf32>
    %c0_19 = arith.constant 0 : index
    %c0_20 = arith.constant 0 : index
    %30 = vector.load %arg8[%c0_19, %c0_20] : memref<1x16xf32, #tpu.memory_space<vmem>>, vector<1x16xf32>
    %cst_21 = arith.constant dense<0.000000e+00> : vector<1x128xf32>
    %31 = tpu.matmul %30, %29, %cst_21 {dimension_numbers = #tpu.dot_dimension_numbers<[1], [1], [0], [0], [0, 0, 1, 0], [], []>} : vector<1x16xf32>, vector<128x16xf32>, vector<1x128xf32> -> vector<1x128xf32>
    %c0_22 = arith.constant 0 : index
    %c0_23 = arith.constant 0 : index
    %32 = vector.load %arg9[%c0_22, %c0_23] : memref<1x1xf32, #tpu.memory_space<vmem>>, vector<1x1xf32>
    %33 = vector.broadcast %32 : vector<1x1xf32> to vector<1x128xf32>
    %34 = arith.addf %31, %33 : vector<1x128xf32>
    %35 = vector.shape_cast %34 : vector<1x128xf32> to vector<1x1x128xf32>
    %c0_24 = arith.constant 0 : index
    %c0_25 = arith.constant 0 : index
    %c0_26 = arith.constant 0 : index
    %36 = vector.load %arg10[%c0_24, %c0_25, %c0_26] : memref<1x1x128xf32, #tpu.memory_space<vmem>>, vector<1x1x128xf32>
    tpu.vector_store %arg10[%c0_24, %c0_25, %c0_26], %35 {strides = array<i32>} : memref<1x1x128xf32, #tpu.memory_space<vmem>>, vector<1x1x128xf32>,
    return
  }
  func.func @transform_0(%arg0: i32) -> (i32, i32) {
    %c0_i32 = arith.constant 0 : i32
    %c0_i32_0 = arith.constant 0 : i32
    return %arg0, %c0_i32 : i32, i32
  }
  func.func @transform_1(%arg0: i32) -> (i32, i32) {
    %c0_i32 = arith.constant 0 : i32
    %c0_i32_0 = arith.constant 0 : i32
    return %arg0, %c0_i32 : i32, i32
  }
  func.func @transform_2(%arg0: i32) -> (i32, i32) {
    %c0_i32 = arith.constant 0 : i32
    %c0_i32_0 = arith.constant 0 : i32
    %c0_i32_1 = arith.constant 0 : i32
    return %c0_i32, %c0_i32_0 : i32, i32
  }
  func.func @transform_3(%arg0: i32) -> (i32, i32) {
    %c0_i32 = arith.constant 0 : i32
    %c0_i32_0 = arith.constant 0 : i32
    %c0_i32_1 = arith.constant 0 : i32
    return %c0_i32, %c0_i32_0 : i32, i32
  }
  func.func @transform_4(%arg0: i32) -> (i32, i32) {
    %c0_i32 = arith.constant 0 : i32
    %c0_i32_0 = arith.constant 0 : i32
    %c0_i32_1 = arith.constant 0 : i32
    return %c0_i32, %c0_i32_0 : i32, i32
  }
  func.func @transform_5(%arg0: i32) -> (i32, i32) {
    %c0_i32 = arith.constant 0 : i32
    %c0_i32_0 = arith.constant 0 : i32
    %c0_i32_1 = arith.constant 0 : i32
    return %c0_i32, %c0_i32_0 : i32, i32
  }
  func.func @transform_6(%arg0: i32) -> (i32, i32) {
    %c0_i32 = arith.constant 0 : i32
    %c0_i32_0 = arith.constant 0 : i32
    %c0_i32_1 = arith.constant 0 : i32
    return %c0_i32, %c0_i32_0 : i32, i32
  }
  func.func @transform_7(%arg0: i32) -> (i32, i32) {
    %c0_i32 = arith.constant 0 : i32
    %c0_i32_0 = arith.constant 0 : i32
    %c0_i32_1 = arith.constant 0 : i32
    return %c0_i32, %c0_i32_0 : i32, i32
  }
  func.func @transform_8(%arg0: i32) -> (i32, i32) {
    %c0_i32 = arith.constant 0 : i32
    %c0_i32_0 = arith.constant 0 : i32
    %c0_i32_1 = arith.constant 0 : i32
    return %c0_i32, %c0_i32_0 : i32, i32
  }
  func.func @transform_9(%arg0: i32) -> (i32, i32, i32) {
    %c0_i32 = arith.constant 0 : i32
    %c0_i32_0 = arith.constant 0 : i32
    %c0_i32_1 = arith.constant 0 : i32
    return %arg0, %c0_i32, %c0_i32_0 : i32, i32, i32
  }
}

</mosaic_0001>

<bundles_post_ra>
// kernel: tpu_custom_call.1
= control target key start
LH: loop header
LB: loop body
LE: loop exit
PB: predicated region body
PF: predicated region fallthrough
CT: control target
= control target key end

     0   :  { %s1325_s0 = inlined_call_operand.vmem [shape: bf16[128,32], index: 0, kind: input, shape index: {}]   ;;  %s1326_s1 = inlined_call_operand.vmem [shape: f32[128,2], index: 1, kind: input, shape index: {}]   ;;  %s1327_s2 = inlined_call_operand.vmem [shape: bf16[32,32], index: 2, kind: input, shape index: {}]   ;;  %s1328_s3 = inlined_call_operand.vmem [shape: f32[2,32], index: 3, kind: input, shape index: {}]   ;;  %s1329_s4 = inlined_call_operand.vmem [shape: f32[1,32], index: 4, kind: input, shape index: {}]   ;;  %s1330_s5 = inlined_call_operand.vmem [shape: bf16[32,16], index: 5, kind: input, shape index: {}]   ;;  %s1331_s6 = inlined_call_operand.vmem [shape: f32[1,16], index: 6, kind: input, shape index: {}]   ;;  %s1332_s7 = inlined_call_operand.vmem [shape: f32[1,16], index: 7, kind: input, shape index: {}]   ;;  %s1333_s8 = inlined_call_operand.<no memory space> [shape: f32[1,1], index: 8, kind: input, shape index: {}]   ;;  %s1334_s9 = inlined_call_operand.hbm [shape: f32[1,1,128], index: 9, kind: output, shape index: {}]  }
   0x1   :  { %v14_v0 = vstv %s1333_s8 }
   0x2   :  { %15 = vst [vmem:[#allocation2] sm:$0x1] %v14_v0 }
   0x3   :  { %v72_v1 = vld [vmem:[%s1328_s3] sm:$0x3]  ;;  %vm122_vm0 = vcmask 1041408   ;;  %vm73_vm1 = vcmask 15360   ;;  %v69_v3 = vld [vmem:[%s1326_s1 + $0x68] sm:$0xff] }
   0x4   :  { %v56_v2 = vld [vmem:[%s1326_s1] sm:$0xff]  ;;  %727 = vmatpush.msk.msra.mxu0 %vm122_vm0, %v72_v1  ;;  %837 = vmatpush.msk.msra.mxu1 %vm122_vm0, %v72_v1  ;;  %v834_v4 = vld [vmem:[%s1327_s2 + $0x8] sm:$0xff] }
   0x5   :  { %728 = vmatmul.msk.f32.vlgmr.msra.gmra.mxu0 %vm73_vm1, %v56_v2  ;;  %741 = vmatmul.msk.f32.vlgmr.msra.gmra.mxu1 %vm73_vm1, %v69_v3  ;;  %v833_v5 = vld [vmem:[%s1327_s2] sm:$0xff] }
   0x6   :  { %838 = vmatpush.bf16.msra.mxu3 %v834_v4  ;;  %274 = vmatpush.bf16.msrb.mxu1 %v834_v4 }
   0x7   :  { %16 = vsyncpa [#allocation4], 0  ;;  %v57_v6 = vld [vmem:[%s1326_s1 + $0x8] sm:$0xff]  ;;  %v70_v7 = vld [vmem:[%s1326_s1 + $0x70] sm:$0xff]  ;;  %vm243_vm2 = vcmask 261120   ;;  %vm638_vm3 = vcmask 130048  }
   0x8   :  { %v827_v8 = vld [vmem:[%s1325_s0 + $0x10] sm:$0xff]  ;;  %v71_v10 = vld [vmem:[%s1326_s1 + $0x78] sm:$0xff]  ;;  %v825_v11 = vld [vmem:[%s1325_s0] sm:$0xff]  ;;  %s1002_s20 = smov [#allocation3]   ;;  %s718_s24 = sshll.u32 %s1334_s9, 4  ;;  %s719_s24 = int_to_ptr.hbm [resolvable:$true] %s718_s24 }
   0x9   :  { %v58_v9 = vld [vmem:[%s1326_s1 + $0x10] sm:$0xff]  ;;  %v59_v12 = vld [vmem:[%s1326_s1 + $0x18] sm:$0xff]  ;;  %v60_v14 = vld [vmem:[%s1326_s1 + $0x20] sm:$0xff]  ;;  %s716_s21 = sshll.u32 %s1002_s20, 4  ;;  %s717_s21 = int_to_ptr.vmem [resolvable:$true] %s716_s21 }
   0xa   :  { %839 = vmatpush.bf16.msra.mxu3 %v833_v5  ;;  %275 = vmatpush.bf16.msrb.mxu1 %v833_v5  ;;  %v828_v13 = vld [vmem:[%s1325_s0 + $0x18] sm:$0xff]  ;;  %v826_v15 = vld [vmem:[%s1325_s0 + $0x8] sm:$0xff]  ;;  %v829_v17 = vld [vmem:[%s1325_s0 + $0x20] sm:$0xff] }
   0xb   :  { %v61_v16 = vld [vmem:[%s1326_s1 + $0x28] sm:$0xff]  ;;  %v62_v18 = vld [vmem:[%s1326_s1 + $0x30] sm:$0xff]  ;;  %v63_v19 = vld [vmem:[%s1326_s1 + $0x38] sm:$0xff] }
   0xc   :  { %v830_v20 = vld [vmem:[%s1325_s0 + $0x28] sm:$0xff]  ;;  %v64_v21 = vld [vmem:[%s1326_s1 + $0x40] sm:$0xff]  ;;  %v831_v23 = vld [vmem:[%s1325_s0 + $0x30] sm:$0xff] }
   0xd   :  { %729 = vmatmul.msk.f32.gmra.mxu0 %vm73_vm1, %v57_v6  ;;  %742 = vmatmul.msk.f32.gmra.mxu1 %vm73_vm1, %v70_v7  ;;  %v65_v22 = vld [vmem:[%s1326_s1 + $0x48] sm:$0xff]  ;;  %v66_v24 = vld [vmem:[%s1326_s1 + $0x50] sm:$0xff]  ;;  %v67_v25 = vld [vmem:[%s1326_s1 + $0x58] sm:$0xff] }
   0xe   :  { %786 = vmatmul.msk.bf16.vlgmr.msra.gmra.mxu3 %vm243_vm2, %v827_v8  ;;  %v832_v26 = vld [vmem:[%s1325_s0 + $0x38] sm:$0xff]  ;;  %v68_v27 = vld [vmem:[%s1326_s1 + $0x60] sm:$0xff]  ;;  %v836_v35 = vld [vmem:[%s1330_s5 + $0x8] sm:$0xff] }
   0xf   :  { %v1173_v37 = vld [vmem:[%s1329_s4] ss:$0 sm:$0xff]  ;;  %491 = vmatpush.bf16.msra.mxu1 %v836_v35  ;;  %840 = vmatpush.bf16.msra.mxu2 %v836_v35 }
  0x10   :  { %v835_v41 = vld [vmem:[%s1330_s5] sm:$0xff] }
  0x13   :  { %492 = vmatpush.bf16.msra.mxu1 %v835_v41  ;;  %841 = vmatpush.bf16.msra.mxu2 %v835_v41 }
  0x15   :  { %730 = vmatmul.msk.f32.gmra.mxu0 %vm73_vm1, %v58_v9  ;;  %743 = vmatmul.msk.f32.gmra.mxu1 %vm73_vm1, %v71_v10 }
  0x1d   :  { %731 = vmatmul.msk.f32.gmra.mxu0 %vm73_vm1, %v59_v12  ;;  %784 = vmatmul.msk.bf16.vlgmr.msrb.gmra.mxu1 %vm243_vm2, %v825_v11 }
  0x1e   :  { %787 = vmatmul.msk.bf16.gmra.mxu3 %vm243_vm2, %v828_v13 }
  0x25   :  { %732 = vmatmul.msk.f32.gmra.mxu0 %vm73_vm1, %v60_v14 }
  0x2d   :  { %733 = vmatmul.msk.f32.gmra.mxu0 %vm73_vm1, %v61_v16  ;;  %785 = vmatmul.msk.bf16.gmra.mxu1 %vm243_vm2, %v826_v15 }
  0x2e   :  { %788 = vmatmul.msk.bf16.gmra.mxu3 %vm243_vm2, %v829_v17 }
  0x35   :  { %734 = vmatmul.msk.f32.gmra.mxu0 %vm73_vm1, %v62_v18 }
  0x3d   :  { %735 = vmatmul.msk.f32.gmra.mxu0 %vm73_vm1, %v63_v19 }
  0x3e   :  { %789 = vmatmul.msk.bf16.gmra.mxu3 %vm243_vm2, %v830_v20 }
  0x45   :  { %736 = vmatmul.msk.f32.gmra.mxu0 %vm73_vm1, %v64_v21 }
  0x4d   :  { %737 = vmatmul.msk.f32.gmra.mxu0 %vm73_vm1, %v65_v22 }
  0x4e   :  { %790 = vmatmul.msk.bf16.gmra.mxu3 %vm243_vm2, %v831_v23 }
  0x55   :  { %738 = vmatmul.msk.f32.gmra.mxu0 %vm73_vm1, %v66_v24 }
  0x5d   :  { %739 = vmatmul.msk.f32.gmra.mxu0 %vm73_vm1, %v67_v25 }
  0x5e   :  { %791 = vmatmul.msk.bf16.gmra.mxu3 %vm243_vm2, %v832_v26 }
  0x65   :  { %740 = vmatmul.msk.f32.gmra.mxu0 %vm73_vm1, %v68_v27 }
  0x82   :  { %v143_v28 = vpop.f32.mrf.mxu0  ;;  %v1161_v29 = vpop.f32.mrf.mxu1 }
  0x8a   :  { %v146_v30 = vpop.f32.mrf.mxu0  ;;  %v1163_v31 = vpop.f32.mrf.mxu1 }
  0x91   :  { %v287_v32 = vpop.f32.mrf.mxu3 }
  0x92   :  { %v149_v33 = vpop.f32.mrf.mxu0  ;;  %v1165_v34 = vpop.f32.mrf.mxu1 }
  0x99   :  { %v289_v36 = vpop.f32.mrf.mxu3 }
  0x9a   :  { %v152_v38 = vpop.f32.mrf.mxu0  ;;  %v277_v39 = vpop.f32.mrf.mxu1 }
  0x9b   :  { %v278_v40 = vadd.f32 %v277_v39, %v143_v28 }
  0x9d   :  { %v321_v42 = vadd.f32 %v1173_v37, %v278_v40 }
  0x9f   :  { %v337_v43 = vsub.f32 0.0, %v321_v42 }
  0xa1   :  { %v292_v44 = vpop.f32.mrf.mxu3  ;;  %v353_v47 = vmul.f32 1.442695, %v337_v43 }
  0xa2   :  { %v155_v45 = vpop.f32.mrf.mxu0  ;;  %v279_v46 = vpop.f32.mrf.mxu1 }
  0xa3   :  { %v288_v48 = vadd.f32 %v287_v32, %v155_v45  ;;  %v280_v49 = vadd.f32 %v279_v46, %v146_v30  ;;  %847 = vpow2.f32 %v353_v47 }
  0xa5   :  { %v1180_v50 = vadd.f32 %v1173_v37, %v288_v48  ;;  %v322_v51 = vadd.f32 %v1173_v37, %v280_v49 }
  0xa7   :  { %v341_v52 = vsub.f32 0.0, %v1180_v50  ;;  %v338_v53 = vsub.f32 0.0, %v322_v51 }
  0xa9   :  { %v361_v54 = vmul.f32 1.442695, %v341_v52  ;;  %v355_v55 = vmul.f32 1.442695, %v338_v53  ;;  %v294_v56 = vpop.f32.mrf.mxu3  ;;  %v848_v61 = vpop.eup %847 }
  0xaa   :  { %v158_v57 = vpop.f32.mrf.mxu0  ;;  %v282_v58 = vpop.f32.mrf.mxu1  ;;  %v385_v2 = vadd.f32 1.0, %v848_v61 }
  0xab   :  { %v290_v59 = vadd.f32 %v289_v36, %v158_v57  ;;  %v283_v60 = vadd.f32 %v282_v58, %v149_v33  ;;  %849 = vpow2.f32 %v361_v54 }
  0xac   :  { %851 = vpow2.f32 %v355_v55 }
  0xad   :  { %v326_v62 = vadd.f32 %v1173_v37, %v290_v59  ;;  %v1186_v63 = vadd.f32 %v1173_v37, %v283_v60 }
  0xaf   :  { %v342_v0 = vsub.f32 0.0, %v326_v62  ;;  %v339_v1 = vsub.f32 0.0, %v1186_v63 }
  0xb1   :  { %v363_v3 = vmul.f32 1.442695, %v342_v0  ;;  %v297_v4 = vpop.f32.mrf.mxu3  ;;  %v850_v5 = vpop.eup %849  ;;  %v357_v9 = vmul.f32 1.442695, %v339_v1 }
  0xb2   :  { %v161_v6 = vpop.f32.mrf.mxu0  ;;  %v284_v7 = vpop.f32.mrf.mxu1  ;;  %v389_v15 = vadd.f32 1.0, %v850_v5 }
  0xb3   :  { %v852_v8 = vpop.eup %851  ;;  %853 = vpow2.f32 %v363_v3  ;;  %v293_v10 = vadd.f32 %v292_v44, %v161_v6  ;;  %v285_v11 = vadd.f32 %v284_v7, %v152_v38 }
  0xb4   :  { %855 = vrcp.f32 %v385_v2  ;;  %v386_v12 = vadd.f32 1.0, %v852_v8 }
  0xb5   :  { %v1190_v13 = vadd.f32 %v1173_v37, %v293_v10  ;;  %v324_v14 = vadd.f32 %v1173_v37, %v285_v11 }
  0xb6   :  { %857 = vrcp.f32 %v386_v12 }
  0xb7   :  { %859 = vpow2.f32 %v357_v9  ;;  %v343_v16 = vsub.f32 0.0, %v1190_v13  ;;  %v340_v17 = vsub.f32 0.0, %v324_v14 }
  0xb8   :  { %861 = vrcp.f32 %v389_v15 }
  0xb9   :  { %v854_v18 = vpop.eup %853  ;;  %v365_v19 = vmul.f32 1.442695, %v343_v16  ;;  %v359_v20 = vmul.f32 1.442695, %v340_v17  ;;  %v299_v21 = vpop.f32.mrf.mxu3 }
  0xba   :  { %v856_v22 = vpop.eup %855  ;;  %v390_v23 = vadd.f32 1.0, %v854_v18  ;;  %v164_v24 = vpop.f32.mrf.mxu0 }
  0xbb   :  { %863 = vpow2.f32 %v365_v19  ;;  %v295_v25 = vadd.f32 %v294_v56, %v164_v24  ;;  %v417_v28 = vmul.f32 %v856_v22, %v321_v42 }
  0xbc   :  { %v858_v26 = vpop.eup %857  ;;  %865 = vrcp.f32 %v390_v23 }
  0xbd   :  { %v860_v27 = vpop.eup %859  ;;  %v418_v30 = vmul.f32 %v858_v26, %v322_v51  ;;  %867 = vpow2.f32 %v359_v20  ;;  %v328_v32 = vadd.f32 %v1173_v37, %v295_v25 }
  0xbe   :  { %v862_v36 = vpop.eup %861  ;;  %v387_v38 = vadd.f32 1.0, %v860_v27 }
  0xbf   :  { %v433_v33 = vpack.c.bf16 %v418_v30, %v417_v28  ;;  %v344_v35 = vsub.f32 0.0, %v328_v32  ;;  %v421_v46 = vmul.f32 %v862_v36, %v1180_v50 }
  0xc1   :  { %v864_v39 = vpop.eup %863  ;;  %v367_v40 = vmul.f32 1.442695, %v344_v35  ;;  %800 = vmatmul.msk.bf16.vlgmr.msra.gmra.mxu1 %vm243_vm2, %v433_v33  ;;  %v302_v41 = vpop.f32.mrf.mxu3 }
  0xc2   :  { %v866_v43 = vpop.eup %865  ;;  %v167_v44 = vpop.f32.mrf.mxu0  ;;  %v391_v52 = vadd.f32 1.0, %v864_v39 }
  0xc3   :  { %v868_v45 = vpop.eup %867  ;;  %v422_v47 = vmul.f32 %v866_v43, %v326_v62  ;;  %869 = vpow2.f32 %v367_v40  ;;  %v298_v42 = vadd.f32 %v297_v4, %v167_v44 }
  0xc4   :  { %871 = vrcp.f32 %v387_v38  ;;  %v388_v48 = vadd.f32 1.0, %v868_v45 }
  0xc5   :  { %v329_v49 = vadd.f32 %v1173_v37, %v298_v42  ;;  %v435_v51 = vpack.c.bf16 %v422_v47, %v421_v46 }
  0xc6   :  { %873 = vrcp.f32 %v388_v48 }
  0xc7   :  { %v345_v53 = vsub.f32 0.0, %v329_v49  ;;  %802 = vmatmul.msk.bf16.vlgmr.msra.gmra.mxu2 %vm243_vm2, %v435_v51  ;;  %875 = vrcp.f32 %v391_v52 }
  0xc9   :  { %v870_v54 = vpop.eup %869  ;;  %v369_v55 = vmul.f32 1.442695, %v345_v53  ;;  %v304_v56 = vpop.f32.mrf.mxu3 }
  0xca   :  { %v872_v57 = vpop.eup %871  ;;  %v392_v58 = vadd.f32 1.0, %v870_v54  ;;  %v170_v50 = vpop.f32.mrf.mxu0 }
  0xcb   :  { %877 = vpow2.f32 %v369_v55  ;;  %v300_v59 = vadd.f32 %v299_v21, %v170_v50  ;;  %v419_v61 = vmul.f32 %v872_v57, %v1186_v63 }
  0xcc   :  { %v874_v60 = vpop.eup %873  ;;  %879 = vrcp.f32 %v392_v58 }
  0xcd   :  { %v420_v62 = vmul.f32 %v874_v60, %v324_v14  ;;  %v330_v0 = vadd.f32 %v1173_v37, %v300_v59  ;;  %v876_v3 = vpop.eup %875 }
  0xce   :  { %v423_v9 = vmul.f32 %v876_v3, %v1190_v13 }
  0xcf   :  { %v346_v1 = vsub.f32 0.0, %v330_v0  ;;  %v434_v2 = vpack.c.bf16 %v420_v62, %v419_v61 }
  0xd1   :  { %v878_v4 = vpop.eup %877  ;;  %v371_v5 = vmul.f32 1.442695, %v346_v1  ;;  %801 = vmatmul.msk.bf16.gmra.mxu1 %vm243_vm2, %v434_v2  ;;  %v307_v6 = vpop.f32.mrf.mxu3 }
  0xd2   :  { %v880_v7 = vpop.eup %879  ;;  %v173_v8 = vpop.f32.mrf.mxu0  ;;  %v393_v12 = vadd.f32 1.0, %v878_v4 }
  0xd3   :  { %v424_v10 = vmul.f32 %v880_v7, %v328_v32  ;;  %881 = vpow2.f32 %v371_v5  ;;  %v303_v11 = vadd.f32 %v302_v41, %v173_v8 }
  0xd4   :  { %883 = vrcp.f32 %v393_v12 }
  0xd5   :  { %v331_v63 = vadd.f32 %v1173_v37, %v303_v11  ;;  %v436_v14 = vpack.c.bf16 %v424_v10, %v423_v9 }
  0xd7   :  { %v347_v15 = vsub.f32 0.0, %v331_v63  ;;  %803 = vmatmul.msk.bf16.gmra.mxu2 %vm243_vm2, %v436_v14 }
  0xd9   :  { %v882_v16 = vpop.eup %881  ;;  %v373_v17 = vmul.f32 1.442695, %v347_v15  ;;  %v309_v18 = vpop.f32.mrf.mxu3 }
  0xda   :  { %v394_v19 = vadd.f32 1.0, %v882_v16  ;;  %v176_v20 = vpop.f32.mrf.mxu0  ;;  %v310_v21 = vadd.f32 %v309_v18, %v1161_v29  ;;  %v884_v23 = vpop.eup %883 }
  0xdb   :  { %v305_v22 = vadd.f32 %v304_v56, %v176_v20  ;;  %v425_v30 = vmul.f32 %v884_v23, %v329_v49 }
  0xdc   :  { %885 = vrcp.f32 %v394_v19  ;;  %v334_v24 = vadd.f32 %v1173_v37, %v310_v21 }
  0xdd   :  { %887 = vpow2.f32 %v373_v17  ;;  %v332_v13 = vadd.f32 %v1173_v37, %v305_v22  ;;  %v1224_v22 = vld [vmem:[%s1331_s6] ss:$0 sm:$0xff] }
  0xde   :  { %v350_v36 = vsub.f32 0.0, %v334_v24 }
  0xdf   :  { %v348_v25 = vsub.f32 0.0, %v332_v13 }
  0xe0   :  { %v379_v41 = vmul.f32 1.442695, %v350_v36 }
  0xe1   :  { %v375_v26 = vmul.f32 1.442695, %v348_v25  ;;  %v312_v27 = vpop.f32.mrf.mxu3 }
  0xe2   :  { %v886_v28 = vpop.eup %885  ;;  %v179_v32 = vpop.f32.mrf.mxu0  ;;  %v313_v48 = vadd.f32 %v312_v27, %v1163_v31 }
  0xe3   :  { %v888_v33 = vpop.eup %887  ;;  %v426_v35 = vmul.f32 %v886_v28, %v330_v0  ;;  %889 = vpow2.f32 %v375_v26  ;;  %v308_v38 = vadd.f32 %v307_v6, %v179_v32 }
  0xe4   :  { %v395_v40 = vadd.f32 1.0, %v888_v33  ;;  %v335_v53 = vadd.f32 %v1173_v37, %v313_v48 }
  0xe5   :  { %v333_v29 = vadd.f32 %v1173_v37, %v308_v38  ;;  %v437_v39 = vpack.c.bf16 %v426_v35, %v425_v30 }
  0xe6   :  { %891 = vrcp.f32 %v395_v40  ;;  %v351_v59 = vsub.f32 0.0, %v335_v53 }
  0xe7   :  { %v349_v43 = vsub.f32 0.0, %v333_v29  ;;  %804 = vmatmul.msk.bf16.gmra.mxu2 %vm243_vm2, %v437_v39  ;;  %893 = vpow2.f32 %v379_v41 }
  0xe8   :  { %v381_v31 = vmul.f32 1.442695, %v351_v59 }
  0xe9   :  { %v890_v44 = vpop.eup %889  ;;  %v377_v45 = vmul.f32 1.442695, %v349_v43  ;;  %v314_v46 = vpop.f32.mrf.mxu3 }
  0xea   :  { %v396_v47 = vadd.f32 1.0, %v890_v44  ;;  %v315_v42 = vadd.f32 %v314_v46, %v1165_v34 }
  0xec   :  { %895 = vrcp.f32 %v396_v47  ;;  %v336_v49 = vadd.f32 %v1173_v37, %v315_v42  ;;  %v892_v51 = vpop.eup %891 }
  0xed   :  { %897 = vpow2.f32 %v377_v45  ;;  %v894_v52 = vpop.eup %893  ;;  %v427_v56 = vmul.f32 %v892_v51, %v331_v63 }
  0xee   :  { %v352_v58 = vsub.f32 0.0, %v336_v49  ;;  %v398_v61 = vadd.f32 1.0, %v894_v52 }
  0xf0   :  { %v383_v34 = vmul.f32 1.442695, %v352_v58 }
  0xf2   :  { %v896_v54 = vpop.eup %895 }
  0xf3   :  { %v898_v55 = vpop.eup %897  ;;  %v428_v57 = vmul.f32 %v896_v54, %v332_v13 }
  0xf4   :  { %v397_v50 = vadd.f32 1.0, %v898_v55 }
  0xf5   :  { %v438_v60 = vpack.c.bf16 %v428_v57, %v427_v56 }
  0xf6   :  { %899 = vrcp.f32 %v397_v50 }
  0xf7   :  { %805 = vmatmul.msk.bf16.gmra.mxu2 %vm243_vm2, %v438_v60  ;;  %901 = vrcp.f32 %v398_v61 }
  0xf8   :  { %903 = vpow2.f32 %v383_v34 }
  0xf9   :  { %905 = vpow2.f32 %v381_v31 }
  0xfc   :  { %v900_v62 = vpop.eup %899 }
  0xfd   :  { %v902_v0 = vpop.eup %901  ;;  %v429_v1 = vmul.f32 %v900_v62, %v333_v29 }
  0xfe   :  { %v904_v37 = vpop.eup %903  ;;  %v430_v3 = vmul.f32 %v902_v0, %v334_v24 }
  0xff   :  { %v906_v2 = vpop.eup %905  ;;  %v400_v4 = vadd.f32 1.0, %v904_v37 }
 0x100   :  { %v439_v5 = vpack.c.bf16 %v430_v3, %v429_v1  ;;  %v399_v6 = vadd.f32 1.0, %v906_v2 }
 0x101   :  { %907 = vrcp.f32 %v400_v4 }
 0x102   :  { %909 = vrcp.f32 %v399_v6 }
 0x107   :  { %806 = vmatmul.msk.bf16.gmra.mxu2 %vm243_vm2, %v439_v5  ;;  %v908_v7 = vpop.eup %907 }
 0x108   :  { %v910_v8 = vpop.eup %909  ;;  %v432_v9 = vmul.f32 %v908_v7, %v336_v49 }
 0x109   :  { %v431_v10 = vmul.f32 %v910_v8, %v335_v53 }
 0x10b   :  { %v440_v11 = vpack.c.bf16 %v432_v9, %v431_v10 }
 0x117   :  { %807 = vmatmul.msk.bf16.gmra.mxu2 %vm243_vm2, %v440_v11 }
 0x13e   :  { %v1235_v35 = vpop.f32.mrf.mxu1 }
 0x146   :  { %v1249_v48 = vpop.f32.mrf.mxu1 }
 0x14a   :  { %v1217_v12 = vpop.f32.mrf.mxu2 }
 0x14e   :  { %v499_v0 = vpop.f32.mrf.mxu1 }
 0x152   :  { %v1219_v63 = vpop.f32.mrf.mxu2 }
 0x153   :  { %v1266_v7 = vadd.f32 %v1224_v22, %v1219_v63 }
 0x15a   :  { %v509_v14 = vpop.f32.mrf.mxu2 }
 0x15b   :  { %v1260_v37 = vadd.f32 %v1224_v22, %v509_v14 }
 0x15d   :  { %v540_v8 = vsub.f32 0.0, %v1260_v37 }
 0x15f   :  { %v562_v63 = vmul.f32 1.442695, %v540_v8 }
 0x162   :  { %v511_v15 = vpop.f32.mrf.mxu2 }
 0x163   :  { %v1256_v58 = vadd.f32 %v1224_v22, %v511_v15 }
 0x165   :  { %v541_v1 = vsub.f32 0.0, %v1256_v58 }
 0x167   :  { %v564_v9 = vmul.f32 1.442695, %v541_v1 }
 0x16a   :  { %v514_v16 = vpop.f32.mrf.mxu2 }
 0x16b   :  { %v1252_v53 = vadd.f32 %v1224_v22, %v514_v16  ;;  %v1273_v16 = vadd.f32 %v1224_v22, %v1217_v12 }
 0x16d   :  { %v542_v50 = vsub.f32 0.0, %v1252_v53 }
 0x16f   :  { %v566_v2 = vmul.f32 1.442695, %v542_v50 }
 0x172   :  { %v516_v17 = vpop.f32.mrf.mxu2 }
 0x173   :  { %v1246_v46 = vadd.f32 %v1224_v22, %v516_v17  ;;  %v539_v17 = vsub.f32 0.0, %v1266_v7 }
 0x175   :  { %v543_v54 = vsub.f32 0.0, %v1246_v46 }
 0x177   :  { %v568_v59 = vmul.f32 1.442695, %v543_v54 }
 0x17a   :  { %v519_v18 = vpop.f32.mrf.mxu2 }
 0x17b   :  { %v1242_v40 = vadd.f32 %v1224_v22, %v519_v18  ;;  %v501_v18 = vpop.f32.mrf.mxu1 }
 0x17d   :  { %v544_v47 = vsub.f32 0.0, %v1242_v40 }
 0x17f   :  { %v570_v55 = vmul.f32 1.442695, %v544_v47 }
 0x182   :  { %v521_v19 = vpop.f32.mrf.mxu2 }
 0x183   :  { %v1238_v36 = vadd.f32 %v1224_v22, %v521_v19 }
 0x185   :  { %v545_v41 = vsub.f32 0.0, %v1238_v36 }
 0x187   :  { %v572_v42 = vmul.f32 1.442695, %v545_v41 }
 0x18a   :  { %v524_v20 = vpop.f32.mrf.mxu2 }
 0x18b   :  { %v1231_v27 = vadd.f32 %v1224_v22, %v524_v20 }
 0x18d   :  { %v546_v38 = vsub.f32 0.0, %v1231_v27 }
 0x18f   :  { %v574_v43 = vmul.f32 1.442695, %v546_v38 }
 0x192   :  { %v526_v21 = vpop.f32.mrf.mxu2 }
 0x193   :  { %v1228_v24 = vadd.f32 %v1224_v22, %v526_v21 }
 0x195   :  { %v547_v28 = vsub.f32 0.0, %v1228_v24 }
 0x197   :  { %v576_v29 = vmul.f32 1.442695, %v547_v28 }
 0x19a   :  { %v529_v13 = vpop.f32.mrf.mxu2 }
 0x19b   :  { %v530_v23 = vadd.f32 %v1224_v22, %v529_v13 }
 0x19d   :  { %v548_v25 = vsub.f32 0.0, %v530_v23 }
 0x19f   :  { %v578_v30 = vmul.f32 1.442695, %v548_v25  ;;  %v1280_v25 = vadd.f32 %v1224_v22, %v501_v18 }
 0x1a1   :  { %911 = vpow2.f32 %v578_v30 }
 0x1a2   :  { %v531_v26 = vpop.f32.mrf.mxu2 }
 0x1a3   :  { %v532_v32 = vadd.f32 %v1224_v22, %v531_v26 }
 0x1a5   :  { %v549_v33 = vsub.f32 0.0, %v532_v32 }
 0x1a7   :  { %v580_v39 = vmul.f32 1.442695, %v549_v33  ;;  %v912_v44 = vpop.eup %911  ;;  %v1285_v33 = vadd.f32 %v1224_v22, %v499_v0 }
 0x1a8   :  { %v596_v49 = vadd.f32 1.0, %v912_v44 }
 0x1a9   :  { %913 = vpow2.f32 %v580_v39 }
 0x1aa   :  { %915 = vpow2.f32 %v576_v29 }
 0x1ab   :  { %917 = vpow2.f32 %v574_v43  ;;  %v1292_v43 = vadd.f32 %v1224_v22, %v1249_v48 }
 0x1af   :  { %v914_v45 = vpop.eup %913 }
 0x1b0   :  { %v597_v51 = vadd.f32 1.0, %v914_v45  ;;  %v916_v52 = vpop.eup %915 }
 0x1b1   :  { %v595_v56 = vadd.f32 1.0, %v916_v52  ;;  %v918_v57 = vpop.eup %917 }
 0x1b2   :  { %919 = vrcp.f32 %v597_v51  ;;  %v594_v61 = vadd.f32 1.0, %v918_v57  ;;  %v535_v51 = vsub.f32 0.0, %v1292_v43 }
 0x1b3   :  { %921 = vpow2.f32 %v572_v42 }
 0x1b4   :  { %923 = vrcp.f32 %v596_v49  ;;  %v552_v50 = vmul.f32 1.442695, %v535_v51 }
 0x1b5   :  { %925 = vpow2.f32 %v570_v55 }
 0x1b6   :  { %927 = vrcp.f32 %v595_v56 }
 0x1b7   :  { %929 = vpow2.f32 %v568_v59 }
 0x1b8   :  { %v920_v60 = vpop.eup %919  ;;  %931 = vrcp.f32 %v594_v61 }
 0x1b9   :  { %v922_v34 = vpop.eup %921  ;;  %v629_v31 = vmul.f32 %v920_v60, %v532_v32  ;;  %933 = vpow2.f32 %v566_v2  ;;  %v631_v60 = vld [vmem:[#allocation2] sm:$0x1] }
 0x1ba   :  { %v924_v62 = vpop.eup %923  ;;  %v593_v3 = vadd.f32 1.0, %v922_v34  ;;  %v1001_v34 = vmov 0  }
 0x1bb   :  { %808 = vmatpush.xpose.msk.msrb.mxu3 %vm638_vm3, %v629_v31  ;;  %v926_v4 = vpop.eup %925  ;;  %v628_v5 = vmul.f32 %v924_v62, %v530_v23  ;;  %v538_v23 = vsub.f32 0.0, %v1273_v16  ;;  %844 = vset.pattern.permute.xlu0 %v1001_v34 }
 0x1bc   :  { %v928_v6 = vpop.eup %927  ;;  %v592_v10 = vadd.f32 1.0, %v926_v4  ;;  %935 = vrcp.f32 %v593_v3  ;;  %634 = vperm.xlu0 %844, %v631_v60  }
 0x1bd   :  { %v930_v11 = vpop.eup %929  ;;  %v627_v14 = vmul.f32 %v928_v6, %v1228_v24  ;;  %937 = vpow2.f32 %v564_v9  ;;  %v560_v24 = vmul.f32 1.442695, %v539_v17  ;;  %v558_v32 = vmul.f32 1.442695, %v538_v23  ;;  %v630_v17 = vld [vmem:[%s1332_s7] sm:$0x1] }
 0x1be   :  { %v932_v15 = vpop.eup %931  ;;  %v591_v19 = vadd.f32 1.0, %v930_v11  ;;  %939 = vrcp.f32 %v592_v10 }
 0x1bf   :  { %809 = vmatpush.xpose.msk.msrb.mxu3 %vm638_vm3, %v628_v5  ;;  %v934_v20 = vpop.eup %933  ;;  %v626_v21 = vmul.f32 %v932_v15, %v1231_v27  ;;  %941 = vpow2.f32 %v562_v63  ;;  %v537_v27 = vsub.f32 0.0, %v1280_v25 }
 0x1c0   :  { %v590_v12 = vadd.f32 1.0, %v934_v20  ;;  %943 = vrcp.f32 %v591_v19 }
 0x1c1   :  { %945 = vpow2.f32 %v560_v24  ;;  %v556_v44 = vmul.f32 1.442695, %v537_v27 }
 0x1c2   :  { %v936_v13 = vpop.eup %935  ;;  %947 = vrcp.f32 %v590_v12 }
 0x1c3   :  { %810 = vmatpush.xpose.msk.msrb.mxu3 %vm638_vm3, %v627_v14  ;;  %v938_v26 = vpop.eup %937  ;;  %v625_v28 = vmul.f32 %v936_v13, %v1238_v36  ;;  %949 = vpow2.f32 %v558_v32  ;;  %v536_v36 = vsub.f32 0.0, %v1285_v33 }
 0x1c4   :  { %v940_v30 = vpop.eup %939  ;;  %v589_v38 = vadd.f32 1.0, %v938_v26 }
 0x1c5   :  { %v942_v29 = vpop.eup %941  ;;  %v624_v39 = vmul.f32 %v940_v30, %v1242_v40  ;;  %v495_v40 = vadd.f32 %v1224_v22, %v1235_v35  ;;  %v554_v52 = vmul.f32 1.442695, %v536_v36 }
 0x1c6   :  { %v944_v41 = vpop.eup %943  ;;  %v588_v45 = vadd.f32 1.0, %v942_v29  ;;  %951 = vrcp.f32 %v589_v38 }
 0x1c7   :  { %811 = vmatpush.xpose.msk.msrb.mxu3 %vm638_vm3, %v626_v21  ;;  %v946_v47 = vpop.eup %945  ;;  %v623_v42 = vmul.f32 %v944_v41, %v1246_v46  ;;  %953 = vpow2.f32 %v556_v44  ;;  %v534_v57 = vsub.f32 0.0, %v495_v40 }
 0x1c8   :  { %v948_v49 = vpop.eup %947  ;;  %v587_v48 = vadd.f32 1.0, %v946_v47  ;;  %955 = vrcp.f32 %v588_v45 }
 0x1c9   :  { %v950_v54 = vpop.eup %949  ;;  %v622_v55 = vmul.f32 %v948_v49, %v1252_v53  ;;  %957 = vpow2.f32 %v554_v52  ;;  %v550_v61 = vmul.f32 1.442695, %v534_v57 }
 0x1ca   :  { %v586_v46 = vadd.f32 1.0, %v950_v54  ;;  %959 = vrcp.f32 %v587_v48 }
 0x1cb   :  { %812 = vmatpush.xpose.msk.msrb.mxu3 %vm638_vm3, %v625_v28  ;;  %961 = vpow2.f32 %v552_v50 }
 0x1cc   :  { %v952_v56 = vpop.eup %951  ;;  %963 = vrcp.f32 %v586_v46 }
 0x1cd   :  { %v954_v22 = vpop.eup %953  ;;  %v621_v35 = vmul.f32 %v952_v56, %v1256_v58  ;;  %965 = vpow2.f32 %v550_v61 }
 0x1ce   :  { %v956_v59 = vpop.eup %955  ;;  %v585_v53 = vadd.f32 1.0, %v954_v22 }
 0x1cf   :  { %813 = vmatpush.xpose.msk.msrb.mxu3 %vm638_vm3, %v624_v39  ;;  %v958_v31 = vpop.eup %957  ;;  %v620_v62 = vmul.f32 %v956_v59, %v1260_v37 }
 0x1d0   :  { %v960_v0 = vpop.eup %959  ;;  %v584_v1 = vadd.f32 1.0, %v958_v31  ;;  %967 = vrcp.f32 %v585_v53 }
 0x1d1   :  { %v962_v58 = vpop.eup %961  ;;  %v619_v2 = vmul.f32 %v960_v0, %v1266_v7 }
 0x1d2   :  { %v964_v3 = vpop.eup %963  ;;  %v583_v4 = vadd.f32 1.0, %v962_v58  ;;  %969 = vrcp.f32 %v584_v1 }
 0x1d3   :  { %814 = vmatpush.xpose.msk.msrb.mxu3 %vm638_vm3, %v623_v42  ;;  %v966_v5 = vpop.eup %965  ;;  %v618_v6 = vmul.f32 %v964_v3, %v1273_v16 }
 0x1d4   :  { %v582_v37 = vadd.f32 1.0, %v966_v5  ;;  %971 = vrcp.f32 %v583_v4 }
 0x1d6   :  { %v968_v8 = vpop.eup %967  ;;  %973 = vrcp.f32 %v582_v37 }
 0x1d7   :  { %815 = vmatpush.xpose.msk.msrb.mxu3 %vm638_vm3, %v622_v55  ;;  %v617_v9 = vmul.f32 %v968_v8, %v1280_v25 }
 0x1d8   :  { %v970_v10 = vpop.eup %969 }
 0x1d9   :  { %v616_v7 = vmul.f32 %v970_v10, %v1285_v33 }
 0x1da   :  { %v972_v11 = vpop.eup %971 }
 0x1db   :  { %816 = vmatpush.xpose.msk.msrb.mxu3 %vm638_vm3, %v621_v35  ;;  %v615_v14 = vmul.f32 %v972_v11, %v1292_v43 }
 0x1dc   :  { %v974_v15 = vpop.eup %973 }
 0x1dd   :  { %v614_v16 = vmul.f32 %v974_v15, %v495_v40 }
 0x1df   :  { %817 = vmatpush.xpose.msk.msrb.mxu3 %vm638_vm3, %v620_v62 }
 0x1e3   :  { %818 = vmatpush.xpose.msk.msrb.mxu3 %vm638_vm3, %v619_v2 }
 0x1e7   :  { %819 = vmatpush.xpose.msk.msrb.mxu3 %vm638_vm3, %v618_v6 }
 0x1eb   :  { %820 = vmatpush.xpose.msk.msrb.mxu3 %vm638_vm3, %v617_v9 }
 0x1ef   :  { %821 = vmatpush.xpose.msk.msrb.mxu3 %vm638_vm3, %v616_v7 }
 0x1f3   :  { %822 = vmatpush.xpose.msk.msrb.mxu3 %vm638_vm3, %v615_v14 }
 0x1f7   :  { %823 = vmatpush.xpose.msk.msrb.mxu3 %vm638_vm3, %v614_v16 }
 0x1fa   :  { %824 = vmatmul.msk.f32.vlgmr.msrb.gmra.mxu3 %vm638_vm3, %v630_v17 }
 0x22e   :  { %v635_v63 = vpop.permute.xlu0 %634 }
 0x22f   :  { %v637_v18 = vperm.slane %v635_v63, 0 }
 0x27d   :  { %v707_v19 = vpop.f32.mrf.mxu3 }
 0x27e   :  { %v708_v20 = vadd.f32 %v707_v19, %v637_v18 }
 0x280   :  { %710 = vst [vmem:[#allocation3] sm:$0x1] %v708_v20 }
 0x281   :  { %721 = dma.vmem_to_hbm [thread:$0]  %s717_s21, 16, %s719_s24, [#allocation4]  }
 0x282   :  { %999 = dma.done.wait [#allocation4], 16  }
 0x283   :  { %1000 = vsyncadd [#allocation4], 4294967280 }
 0x284   :  { %726 = vsyncpa [#allocation4], 1 }

</bundles_post_ra>
